<compile_context>
chip_gen: v7x
topology: tpu7x:2x2x1
jax: 0.10.0
libtpu: 0.0.40
codegen_flags: <defaults>
</compile_context>

<pallas_src>
import math

import jax
import jax.numpy as jnp
from jax.experimental import pallas as pl
from jax.experimental.pallas import tpu as pltpu


def _silu(x):
    return x * jax.nn.sigmoid(x)


def sinusoidal_embedding(t, dim):
    assert dim % 2 == 0, "sinusoidal embedding requires an even dim"
    half = dim // 2
    freqs = jnp.exp(-math.log(10000.0) *
                    jnp.arange(half, dtype=jnp.float32) / half)
    args = t.astype(jnp.float32)[:, None] * freqs[None, :]
    return jnp.concatenate([jnp.sin(args), jnp.cos(args)], axis=-1)  # (B, dim)


def init_params(key, dim, c_in, c_out):
    ks = jax.random.split(key, 3)
    scale = 0.1
    return {
        "w_time1": jax.random.normal(ks[0], (dim, dim), jnp.float32) * scale,
        "b_time1": jnp.zeros((1, dim), jnp.float32),
        "w_time2": jax.random.normal(ks[1], (dim, c_out), jnp.float32) * scale,
        "b_time2": jnp.zeros((1, c_out), jnp.float32),
        "w_proj":  jax.random.normal(ks[2], (c_out, c_in), jnp.float32) * scale,
        "b_proj":  jnp.zeros((1, c_out), jnp.float32),
    }


# ----------------------------- kernels ------------------------------------- #

def _mxu_kernel(wp_ref, bias_ref, x_ref, o_ref):
    # wp: (C_out, C_in) VMEM; bias: (C_out, 1) VMEM; x: (C_in, s_tile); o: (C_out, s_tile)
    x = x_ref[...].astype(jnp.float32)
    y = jnp.dot(wp_ref[...], x, preferred_element_type=jnp.float32)
    o_ref[...] = (y + bias_ref[...]).astype(o_ref.dtype)


def _make_vpu_kernel(c_in, c_out):
    # Dense-layout tiny-channel path: per output channel, accumulate full
    # (rows_tile, 128) slabs with scalar weights / bias read from SMEM.  No MXU,
    # no weight tile in VMEM, f32 accumulation regardless of I/O dtype.
    def kernel(wp_ref, bias_ref, x_ref, o_ref):
        # wp: (C_out, C_in) SMEM; bias: (B, C_out) SMEM
        # x:  (C_in, rows_tile, 128) VMEM; o: (C_out, rows_tile, 128) VMEM
        b = pl.program_id(0)
        xs = [x_ref[ci].astype(jnp.float32) for ci in range(c_in)]
        for co in range(c_out):
            acc = xs[0] * wp_ref[co, 0] + bias_ref[b, co]
            for ci in range(1, c_in):
                acc = acc + xs[ci] * wp_ref[co, ci]
            o_ref[co] = acc.astype(o_ref.dtype)
    return kernel


# ----------------------------- tiling -------------------------------------- #

def _choose_rows_tile(R, B, c_in, c_out, itemsize, target_tile_bytes,
                      min_grid_steps=8):
    """Rows (of 128 lanes) per grid step: ~target_tile_bytes per-step HBM payload,
    multiple of 8 (or the full extent R), with enough grid steps for megacore
    sharding + pipeline overlap."""
    bytes_per_row = (c_in + c_out) * 128 * itemsize
    rows = max(8, (target_tile_bytes // bytes_per_row) // 8 * 8)
    if R > 8 and B * pl.cdiv(R, rows) < min_grid_steps:
        steps_needed = -(-min_grid_steps // B)
        rows = max(8, (-(-R // steps_needed)) // 8 * 8)
    if rows >= R:
        return R                      # full extent: allowed for any R
    return rows


# ----------------------------- wrapper -------------------------------------- #

def denoise_forward(x, t, params, *, io_dtype=None, target_tile_bytes=4 << 20):
    B, C_in, H, W = x.shape
    S = H * W
    dim = params["w_time1"].shape[0]
    C_out = params["w_proj"].shape[0]
    io_dtype = jnp.dtype(io_dtype) if io_dtype is not None else jnp.dtype(x.dtype)
    itemsize = io_dtype.itemsize

    # --- timestep MLP hoisted out of the kernel (tiny; XLA fuses it) ----------
    temb = sinusoidal_embedding(t, dim)                                  # (B, dim)
    h = _silu(temb @ params["w_time1"] + params["b_time1"])              # (B, dim)
    tbias = h @ params["w_time2"] + params["b_time2"]                    # (B, C_out)
    fused_bias = (tbias + params["b_proj"]).astype(jnp.float32)          # (B, C_out)

    # NCHW -> (B, C, S): spatial on the 128-lane axis; pad S to a multiple of 128
    # so it maps to dense (rows, 128) vregs.
    x_flat = x.reshape(B, C_in, S).astype(io_dtype)
    S_pad = -(-S // 128) * 128
    if S_pad != S:
        x_flat = jnp.pad(x_flat, ((0, 0), (0, 0), (0, S_pad - S)))
    R = S_pad // 128

    rows_tile = _choose_rows_tile(R, B, C_in, C_out, itemsize, target_tile_bytes)
    n_r = pl.cdiv(R, rows_tile)

    per_step_bytes = (C_in + C_out) * rows_tile * 128 * itemsize
    # Double-buffered in+out tiles + slack; safe on v7x (64 MiB) and v5e/v6e.
    vmem_limit_bytes = int(min(max(2 * per_step_bytes + (4 << 20), 32 << 20),
                               48 << 20))

    cost = pl.CostEstimate(
        flops=2 * B * C_out * C_in * S,
        transcendentals=0,
        bytes_accessed=(C_in + C_out) * B * S * itemsize,
    )
    cparams = pltpu.CompilerParams(
        dimension_semantics=("parallel", "parallel"),
        vmem_limit_bytes=vmem_limit_bytes,
    )

    use_vpu = (C_in <= 32 and C_out <= 32)

    if use_vpu:
        x4 = x_flat.reshape(B, C_in, R, 128)
        kernel = _make_vpu_kernel(C_in, C_out)
        y4 = pl.pallas_call(
            kernel,
            out_shape=jax.ShapeDtypeStruct((B, C_out, R, 128), io_dtype),
            grid=(B, n_r),
            in_specs=[
                pl.BlockSpec(memory_space=pltpu.MemorySpace.SMEM),   # w_proj scalars
                pl.BlockSpec(memory_space=pltpu.MemorySpace.SMEM),   # fused bias (B, C_out)
                pl.BlockSpec((None, C_in, rows_tile, 128),
                             lambda b, r: (b, 0, r, 0)),             # x tile
            ],
            out_specs=pl.BlockSpec((None, C_out, rows_tile, 128),
                                   lambda b, r: (b, 0, r, 0)),
            compiler_params=cparams,
            cost_estimate=cost,
        )(params["w_proj"].astype(jnp.float32), fused_bias, x4)
        y_flat = y4.reshape(B, C_out, S_pad)
    else:
        s_tile = rows_tile * 128
        y_flat = pl.pallas_call(
            _mxu_kernel,
            out_shape=jax.ShapeDtypeStruct((B, C_out, S_pad), io_dtype),
            grid=(B, n_r),
            in_specs=[
                pl.BlockSpec((C_out, C_in), lambda b, s: (0, 0)),         # w_proj
                pl.BlockSpec((None, C_out, 1), lambda b, s: (b, 0, 0)),   # fused bias
                pl.BlockSpec((None, C_in, s_tile), lambda b, s: (b, 0, s)),
            ],
            out_specs=pl.BlockSpec((None, C_out, s_tile), lambda b, s: (b, 0, s)),
            compiler_params=cparams,
            cost_estimate=cost,
        )(params["w_proj"].astype(jnp.float32), fused_bias[:, :, None], x_flat)

    if S_pad != S:
        y_flat = y_flat[:, :, :S]
    return y_flat.reshape(B, C_out, H, W)


# ----------------------------- reference ------------------------------------ #

def denoise_reference(x, t, params):
    dim = params["w_time1"].shape[0]
    temb = sinusoidal_embedding(t, dim)
    h = _silu(temb @ params["w_time1"] + params["b_time1"])
    tbias = h @ params["w_time2"] + params["b_time2"]          # (B, C_out)
    y = jnp.einsum("oc,bchw->bohw", params["w_proj"], x,
                   precision=jax.lax.Precision.HIGHEST)
    y = y + params["b_proj"][0][None, :, None, None]
    y = y + tbias[:, :, None, None]
    return y


if __name__ == "__main__":
    cfg = {"dim": 32, "in_channels": 4, "out_channels": None}
    dim = cfg["dim"]
    c_in = cfg["in_channels"]
    c_out = cfg["out_channels"] or cfg["in_channels"]

    key = jax.random.PRNGKey(0)
    kx, kt, kp, kx2, kp2 = jax.random.split(key, 5)

    x = jax.random.normal(kx, (2, c_in, 16, 16), jnp.float32)   # NCHW
    t = jax.random.uniform(kt, (2,), jnp.float32) * 1000.0
    params = init_params(kp, dim, c_in, c_out)

    # f32 I/O, dense-layout VPU path (tiny channel count).
    y = jax.block_until_ready(denoise_forward(x, t, params))
    y_ref = denoise_reference(x, t, params)
    assert y.shape == (2, c_out, 16, 16)
    assert jnp.allclose(y, y_ref, atol=1e-3, rtol=1e-3)

    # bf16 I/O at the pallas_call boundary (f32 accumulate in-kernel).
    y_bf16 = jax.block_until_ready(
        denoise_forward(x, t, params, io_dtype=jnp.bfloat16))
    assert jnp.allclose(y_bf16.astype(jnp.float32), y_ref, atol=3e-2, rtol=3e-2)

    # Wider channel count exercises the MXU fallback path.
    c_big = 40
    x_big = jax.random.normal(kx2, (2, c_big, 16, 16), jnp.float32)
    params_big = init_params(kp2, dim, c_big, c_big)
    y_big = jax.block_until_ready(denoise_forward(x_big, t, params_big))
    y_big_ref = denoise_reference(x_big, t, params_big)
    assert jnp.allclose(y_big, y_big_ref, atol=2e-2, rtol=2e-2)

    print("KERNEL_OK")
</pallas_src>

<mosaic_0001>
module attributes {stable_mosaic.version = 11 : i64} {
  func.func @kernel(%arg0: i32, %arg1: i32, %arg2: memref<4x4xf32, #tpu.memory_space<smem>>, %arg3: memref<2x4xf32, #tpu.memory_space<smem>>, %arg4: memref<1x4x2x128xf32, #tpu.memory_space<vmem>>, %arg5: memref<1x4x2x128xf32, #tpu.memory_space<vmem>>) attributes {dimension_semantics = [#tpu.dimension_semantics<parallel>, #tpu.dimension_semantics<parallel>], iteration_bounds = array<i64: 2, 1>, scalar_prefetch = 0 : i64, scratch_operands = 0 : i64, tpu.core_type = #tpu.core_type<tc>, window_params = [{transform_indices = @transform_0, window_bounds = array<i64: 4, 4>}, {transform_indices = @transform_1, window_bounds = array<i64: 2, 4>}, {transform_indices = @transform_2, window_bounds = array<i64: 1, 4, 2, 128>}, {transform_indices = @transform_3, window_bounds = array<i64: 1, 4, 2, 128>}]} {
    %c0 = arith.constant 0 : index
    %c0_0 = arith.constant 0 : index
    %c0_1 = arith.constant 0 : index
    %c0_2 = arith.constant 0 : index
    %0 = vector.load %arg4[%c0, %c0_0, %c0_1, %c0_2] : memref<1x4x2x128xf32, #tpu.memory_space<vmem>>, vector<1x1x2x128xf32>
    %1 = vector.shape_cast %0 : vector<1x1x2x128xf32> to vector<2x128xf32>
    %c0_3 = arith.constant 0 : index
    %c1 = arith.constant 1 : index
    %c0_4 = arith.constant 0 : index
    %c0_5 = arith.constant 0 : index
    %2 = vector.load %arg4[%c0_3, %c1, %c0_4, %c0_5] : memref<1x4x2x128xf32, #tpu.memory_space<vmem>>, vector<1x1x2x128xf32>
    %3 = vector.shape_cast %2 : vector<1x1x2x128xf32> to vector<2x128xf32>
    %c0_6 = arith.constant 0 : index
    %c2 = arith.constant 2 : index
    %c0_7 = arith.constant 0 : index
    %c0_8 = arith.constant 0 : index
    %4 = vector.load %arg4[%c0_6, %c2, %c0_7, %c0_8] : memref<1x4x2x128xf32, #tpu.memory_space<vmem>>, vector<1x1x2x128xf32>
    %5 = vector.shape_cast %4 : vector<1x1x2x128xf32> to vector<2x128xf32>
    %c0_9 = arith.constant 0 : index
    %c3 = arith.constant 3 : index
    %c0_10 = arith.constant 0 : index
    %c0_11 = arith.constant 0 : index
    %6 = vector.load %arg4[%c0_9, %c3, %c0_10, %c0_11] : memref<1x4x2x128xf32, #tpu.memory_space<vmem>>, vector<1x1x2x128xf32>
    %7 = vector.shape_cast %6 : vector<1x1x2x128xf32> to vector<2x128xf32>
    %c0_12 = arith.constant 0 : index
    %c0_13 = arith.constant 0 : index
    %8 = memref.load %arg2[%c0_12, %c0_13] : memref<4x4xf32, #tpu.memory_space<smem>>
    %9 = vector.broadcast %8 : f32 to vector<2x128xf32>
    %10 = arith.mulf %1, %9 : vector<2x128xf32>
    %11 = arith.index_cast %arg0 : i32 to index
    %c0_14 = arith.constant 0 : index
    %12 = memref.load %arg3[%11, %c0_14] : memref<2x4xf32, #tpu.memory_space<smem>>
    %13 = vector.broadcast %12 : f32 to vector<2x128xf32>
    %14 = arith.addf %10, %13 : vector<2x128xf32>
    %c0_15 = arith.constant 0 : index
    %c1_16 = arith.constant 1 : index
    %15 = memref.load %arg2[%c0_15, %c1_16] : memref<4x4xf32, #tpu.memory_space<smem>>
    %16 = vector.broadcast %15 : f32 to vector<2x128xf32>
    %17 = arith.mulf %3, %16 : vector<2x128xf32>
    %18 = arith.addf %14, %17 : vector<2x128xf32>
    %c0_17 = arith.constant 0 : index
    %c2_18 = arith.constant 2 : index
    %19 = memref.load %arg2[%c0_17, %c2_18] : memref<4x4xf32, #tpu.memory_space<smem>>
    %20 = vector.broadcast %19 : f32 to vector<2x128xf32>
    %21 = arith.mulf %5, %20 : vector<2x128xf32>
    %22 = arith.addf %18, %21 : vector<2x128xf32>
    %c0_19 = arith.constant 0 : index
    %c3_20 = arith.constant 3 : index
    %23 = memref.load %arg2[%c0_19, %c3_20] : memref<4x4xf32, #tpu.memory_space<smem>>
    %24 = vector.broadcast %23 : f32 to vector<2x128xf32>
    %25 = arith.mulf %7, %24 : vector<2x128xf32>
    %26 = arith.addf %22, %25 : vector<2x128xf32>
    %c0_21 = arith.constant 0 : index
    %c0_22 = arith.constant 0 : index
    %c0_23 = arith.constant 0 : index
    %c0_24 = arith.constant 0 : index
    %27 = vector.load %arg5[%c0_21, %c0_22, %c0_23, %c0_24] : memref<1x4x2x128xf32, #tpu.memory_space<vmem>>, vector<1x1x2x128xf32>
    %28 = vector.shape_cast %27 : vector<1x1x2x128xf32> to vector<2x128xf32>
    %29 = vector.shape_cast %26 : vector<2x128xf32> to vector<1x1x2x128xf32>
    tpu.vector_store %arg5[%c0_21, %c0_22, %c0_23, %c0_24], %29 {strides = array<i32>} : memref<1x4x2x128xf32, #tpu.memory_space<vmem>>, vector<1x1x2x128xf32>,
    %c1_25 = arith.constant 1 : index
    %c0_26 = arith.constant 0 : index
    %30 = memref.load %arg2[%c1_25, %c0_26] : memref<4x4xf32, #tpu.memory_space<smem>>
    %31 = vector.broadcast %30 : f32 to vector<2x128xf32>
    %32 = arith.mulf %1, %31 : vector<2x128xf32>
    %33 = arith.index_cast %arg0 : i32 to index
    %c1_27 = arith.constant 1 : index
    %34 = memref.load %arg3[%33, %c1_27] : memref<2x4xf32, #tpu.memory_space<smem>>
    %35 = vector.broadcast %34 : f32 to vector<2x128xf32>
    %36 = arith.addf %32, %35 : vector<2x128xf32>
    %c1_28 = arith.constant 1 : index
    %c1_29 = arith.constant 1 : index
    %37 = memref.load %arg2[%c1_28, %c1_29] : memref<4x4xf32, #tpu.memory_space<smem>>
    %38 = vector.broadcast %37 : f32 to vector<2x128xf32>
    %39 = arith.mulf %3, %38 : vector<2x128xf32>
    %40 = arith.addf %36, %39 : vector<2x128xf32>
    %c1_30 = arith.constant 1 : index
    %c2_31 = arith.constant 2 : index
    %41 = memref.load %arg2[%c1_30, %c2_31] : memref<4x4xf32, #tpu.memory_space<smem>>
    %42 = vector.broadcast %41 : f32 to vector<2x128xf32>
    %43 = arith.mulf %5, %42 : vector<2x128xf32>
    %44 = arith.addf %40, %43 : vector<2x128xf32>
    %c1_32 = arith.constant 1 : index
    %c3_33 = arith.constant 3 : index
    %45 = memref.load %arg2[%c1_32, %c3_33] : memref<4x4xf32, #tpu.memory_space<smem>>
    %46 = vector.broadcast %45 : f32 to vector<2x128xf32>
    %47 = arith.mulf %7, %46 : vector<2x128xf32>
    %48 = arith.addf %44, %47 : vector<2x128xf32>
    %c0_34 = arith.constant 0 : index
    %c1_35 = arith.constant 1 : index
    %c0_36 = arith.constant 0 : index
    %c0_37 = arith.constant 0 : index
    %49 = vector.load %arg5[%c0_34, %c1_35, %c0_36, %c0_37] : memref<1x4x2x128xf32, #tpu.memory_space<vmem>>, vector<1x1x2x128xf32>
    %50 = vector.shape_cast %49 : vector<1x1x2x128xf32> to vector<2x128xf32>
    %51 = vector.shape_cast %48 : vector<2x128xf32> to vector<1x1x2x128xf32>
    tpu.vector_store %arg5[%c0_34, %c1_35, %c0_36, %c0_37], %51 {strides = array<i32>} : memref<1x4x2x128xf32, #tpu.memory_space<vmem>>, vector<1x1x2x128xf32>,
    %c2_38 = arith.constant 2 : index
    %c0_39 = arith.constant 0 : index
    %52 = memref.load %arg2[%c2_38, %c0_39] : memref<4x4xf32, #tpu.memory_space<smem>>
    %53 = vector.broadcast %52 : f32 to vector<2x128xf32>
    %54 = arith.mulf %1, %53 : vector<2x128xf32>
    %55 = arith.index_cast %arg0 : i32 to index
    %c2_40 = arith.constant 2 : index
    %56 = memref.load %arg3[%55, %c2_40] : memref<2x4xf32, #tpu.memory_space<smem>>
    %57 = vector.broadcast %56 : f32 to vector<2x128xf32>
    %58 = arith.addf %54, %57 : vector<2x128xf32>
    %c2_41 = arith.constant 2 : index
    %c1_42 = arith.constant 1 : index
    %59 = memref.load %arg2[%c2_41, %c1_42] : memref<4x4xf32, #tpu.memory_space<smem>>
    %60 = vector.broadcast %59 : f32 to vector<2x128xf32>
    %61 = arith.mulf %3, %60 : vector<2x128xf32>
    %62 = arith.addf %58, %61 : vector<2x128xf32>
    %c2_43 = arith.constant 2 : index
    %c2_44 = arith.constant 2 : index
    %63 = memref.load %arg2[%c2_43, %c2_44] : memref<4x4xf32, #tpu.memory_space<smem>>
    %64 = vector.broadcast %63 : f32 to vector<2x128xf32>
    %65 = arith.mulf %5, %64 : vector<2x128xf32>
    %66 = arith.addf %62, %65 : vector<2x128xf32>
    %c2_45 = arith.constant 2 : index
    %c3_46 = arith.constant 3 : index
    %67 = memref.load %arg2[%c2_45, %c3_46] : memref<4x4xf32, #tpu.memory_space<smem>>
    %68 = vector.broadcast %67 : f32 to vector<2x128xf32>
    %69 = arith.mulf %7, %68 : vector<2x128xf32>
    %70 = arith.addf %66, %69 : vector<2x128xf32>
    %c0_47 = arith.constant 0 : index
    %c2_48 = arith.constant 2 : index
    %c0_49 = arith.constant 0 : index
    %c0_50 = arith.constant 0 : index
    %71 = vector.load %arg5[%c0_47, %c2_48, %c0_49, %c0_50] : memref<1x4x2x128xf32, #tpu.memory_space<vmem>>, vector<1x1x2x128xf32>
    %72 = vector.shape_cast %71 : vector<1x1x2x128xf32> to vector<2x128xf32>
    %73 = vector.shape_cast %70 : vector<2x128xf32> to vector<1x1x2x128xf32>
    tpu.vector_store %arg5[%c0_47, %c2_48, %c0_49, %c0_50], %73 {strides = array<i32>} : memref<1x4x2x128xf32, #tpu.memory_space<vmem>>, vector<1x1x2x128xf32>,
    %c3_51 = arith.constant 3 : index
    %c0_52 = arith.constant 0 : index
    %74 = memref.load %arg2[%c3_51, %c0_52] : memref<4x4xf32, #tpu.memory_space<smem>>
    %75 = vector.broadcast %74 : f32 to vector<2x128xf32>
    %76 = arith.mulf %1, %75 : vector<2x128xf32>
    %77 = arith.index_cast %arg0 : i32 to index
    %c3_53 = arith.constant 3 : index
    %78 = memref.load %arg3[%77, %c3_53] : memref<2x4xf32, #tpu.memory_space<smem>>
    %79 = vector.broadcast %78 : f32 to vector<2x128xf32>
    %80 = arith.addf %76, %79 : vector<2x128xf32>
    %c3_54 = arith.constant 3 : index
    %c1_55 = arith.constant 1 : index
    %81 = memref.load %arg2[%c3_54, %c1_55] : memref<4x4xf32, #tpu.memory_space<smem>>
    %82 = vector.broadcast %81 : f32 to vector<2x128xf32>
    %83 = arith.mulf %3, %82 : vector<2x128xf32>
    %84 = arith.addf %80, %83 : vector<2x128xf32>
    %c3_56 = arith.constant 3 : index
    %c2_57 = arith.constant 2 : index
    %85 = memref.load %arg2[%c3_56, %c2_57] : memref<4x4xf32, #tpu.memory_space<smem>>
    %86 = vector.broadcast %85 : f32 to vector<2x128xf32>
    %87 = arith.mulf %5, %86 : vector<2x128xf32>
    %88 = arith.addf %84, %87 : vector<2x128xf32>
    %c3_58 = arith.constant 3 : index
    %c3_59 = arith.constant 3 : index
    %89 = memref.load %arg2[%c3_58, %c3_59] : memref<4x4xf32, #tpu.memory_space<smem>>
    %90 = vector.broadcast %89 : f32 to vector<2x128xf32>
    %91 = arith.mulf %7, %90 : vector<2x128xf32>
    %92 = arith.addf %88, %91 : vector<2x128xf32>
    %c0_60 = arith.constant 0 : index
    %c3_61 = arith.constant 3 : index
    %c0_62 = arith.constant 0 : index
    %c0_63 = arith.constant 0 : index
    %93 = vector.load %arg5[%c0_60, %c3_61, %c0_62, %c0_63] : memref<1x4x2x128xf32, #tpu.memory_space<vmem>>, vector<1x1x2x128xf32>
    %94 = vector.shape_cast %93 : vector<1x1x2x128xf32> to vector<2x128xf32>
    %95 = vector.shape_cast %92 : vector<2x128xf32> to vector<1x1x2x128xf32>
    tpu.vector_store %arg5[%c0_60, %c3_61, %c0_62, %c0_63], %95 {strides = array<i32>} : memref<1x4x2x128xf32, #tpu.memory_space<vmem>>, vector<1x1x2x128xf32>,
    return
  }
  func.func @transform_0(%arg0: i32, %arg1: i32) -> (i32, i32) {
    %c0_i32 = arith.constant 0 : i32
    %c0_i32_0 = arith.constant 0 : i32
    %c0_i32_1 = arith.constant 0 : i32
    return %c0_i32, %c0_i32_0 : i32, i32
  }
  func.func @transform_1(%arg0: i32, %arg1: i32) -> (i32, i32) {
    %c0_i32 = arith.constant 0 : i32
    %c0_i32_0 = arith.constant 0 : i32
    %c0_i32_1 = arith.constant 0 : i32
    return %c0_i32, %c0_i32_0 : i32, i32
  }
  func.func @transform_2(%arg0: i32, %arg1: i32) -> (i32, i32, i32, i32) {
    %c0_i32 = arith.constant 0 : i32
    %c0_i32_0 = arith.constant 0 : i32
    %c0_i32_1 = arith.constant 0 : i32
    return %arg0, %c0_i32, %arg1, %c0_i32_0 : i32, i32, i32, i32
  }
  func.func @transform_3(%arg0: i32, %arg1: i32) -> (i32, i32, i32, i32) {
    %c0_i32 = arith.constant 0 : i32
    %c0_i32_0 = arith.constant 0 : i32
    %c0_i32_1 = arith.constant 0 : i32
    return %arg0, %c0_i32, %arg1, %c0_i32_0 : i32, i32, i32, i32
  }
}

</mosaic_0001>

<bundles_post_ra>
// kernel: tpu_custom_call.1
= control target key start
LH: loop header
LB: loop body
LE: loop exit
PB: predicated region body
PF: predicated region fallthrough
CT: control target
= control target key end

     0   :  { %8 = vsyncpa [#allocation5], 0  ;;  %s1040_s0 = inlined_call_operand.hbm [shape: f32[4,4], index: 0, kind: input, shape index: {}]   ;;  %s1041_s1 = inlined_call_operand.vmem [shape: f32[2,4], index: 1, kind: input, shape index: {}]   ;;  %s1042_s2 = inlined_call_operand.hbm [shape: f32[2,4,2,128], index: 2, kind: input, shape index: {}]   ;;  %s1043_s3 = inlined_call_operand.hbm [shape: f32[2,4,2,128], index: 3, kind: output, shape index: {}]  }
   0x1   :  { %9 = vsyncpa [#allocation6], 0 }
   0x2   :  { %10 = vsyncpa [#allocation3], 0 }
   0x3   :  { %12 = vsyncpa [#allocation3 + $0x1], 0 }
   0x4   :  { %13 = vsyncpa [#allocation4], 0 }
   0x5   :  { %15 = vsyncpa [#allocation4 + $0x1], 0  ;;  %s753_s12 = smov 0   ;;  %s755_s13 = smov 0  }
   0x6   :  { %s757_s14 = smov 0   ;;  %s759_s15 = smov 0  }
   0x7   :  { %s761_s16 = smov 0   ;;  %s763_s17 = smov 0  }
   0x8 LB: > { %s445_s18 = sadd.s32 4294967295, %s723_s17   ;;  %s446_s19 = sadd.s32 4294967294, %s723_s17   ;;  %s723_s17 = sphi %s763_s17, %s21_s17   ;;  %s719_s16 = sphi %s761_s16, %s1064_s16   ;;  %s715_s15 = sphi %s759_s15, %s1063_s15   ;;  %s711_s14 = sphi %s757_s14, %s1062_s14   ;;  %s707_s13 = sphi %s755_s13, %s1061_s13   ;;  %s703_s12 = sphi %s753_s12, %s1060_s12  }
   0x9   : > { %s84_s20 = sadd.s32 1, %s711_s14  ;;  %p91_p0 = scmp.ne.s32.totalorder %s711_s14, %s707_s13 }
   0xa   : > { %p92_p1 = scmp.eq.s32.totalorder %s723_s17, 0  ;;  %p97_p2 = scmp.ne.s32.totalorder %s707_s13, %s703_s12 }
   0xb   : > { %p791_p3 = scmp.eq.s32.totalorder %s445_s18, 0  ;;  %p123_p4 = scmp.eq.s32.totalorder %s445_s18, 1 }
   0xc   : > { %p93_p5 = por %p92_p1, %p91_p0  ;;  %p129_p6 = scmp.eq.s32.totalorder %s446_s19, 1 }
   0xd   : > { %s1048_s21 = scalar_select %p791_p3, 1, 0 }
   0xe   : > { %p797_p7 = por %p791_p3, %p97_p2  ;;  %p801_p8 = por %p123_p4, %p91_p0 }
   0xf   : > { %p805_p9 = por %p129_p6, %p97_p2  ;;  %p447_p10 = scmp.ge.s32.totalorder %s723_s17, 1 }
  0x10   : > { %s1049_s22 = scalar_select %p797_p7, 1, 0 }
  0x11   : > { %s1050_s23 = scalar_select %p801_p8, 1, 0 }
  0x12   : > { %s1051_s24 = scalar_select %p805_p9, 1, 0 }
  0x13   : > { %p136_p11 = scmp.lt.s32.totalorder %s723_s17, 3  ;;  %p517_p1 = scmp.lt.s32.totalorder %s723_s17, 2 }
  0x14   : > { %s158_s28 = sshll.u32 %s1041_s1, 4  ;;  %s169_s4 = sand.u32 1, %s711_s14   ;;  %s159_s28 = int_to_ptr.vmem [resolvable:$true] %s158_s28 }
  0x15   : > { %p812_p13 = pnand %p447_p10, %p136_p11  ;;  %p822_p4 = pnand %p517_p1, %p93_p5 }
  0x16   : > { %s33_s5 = sadd.s32 1, %s719_s16  ;;  %s575_s8 = scalar_lea.hbm %s1040_s0, 64 }
  0x17   : > { %p500_p0 = pneg %p812_p13  ;;  %p576_p5 = scmp.ne.s32.totalorder %s1040_s0, %s575_s8 }
  0x18   : > { %p582_p1 = scmp.lt.u32.totalorder %s575_s8, %s1040_s0 }
  0x19   : > { %p828_p2 = pnand %p500_p0, %p791_p3 }
  0x1b   : > { %p577_p6 = pneg %p828_p2 }
  0x1d   : > { %p578_p10 = pnand %p577_p6, %p576_p5 }
  0x1f   : > { %p579_p11 = pneg %p578_p10 }
  0x21   : > { %p584_p0 = pnand %p582_p1, %p579_p11 }
  0x23   : > { %587 = shalt.err (!%p584_p0)
}
  0x24   : > { %s725_s19 = smov [#allocation2]   ;;  %s588_s6 = scalar_lea.vmem %s159_s28, 32 }
  0x25   : > { %503 = dma.hbm_to_smem (!%p828_p2), %s1040_s0, 64, %s725_s19, [#allocation5]  }
  0x26   : > { %p589_p12 = scmp.ne.s32.totalorder %s159_s28, %s588_s6  ;;  %p596_p7 = scmp.lt.s32.totalorder %s159_s28, %s159_s28 }
  0x27   : > { %p597_p5 = scmp.lt.s32.totalorder %s588_s6, %s588_s6 }
  0x28   : > { %p591_p9 = pnand %p589_p12, %p577_p6 }
  0x29   : > { %p598_p10 = por %p597_p5, %p596_p7 }
  0x2a   : > { %p592_p8 = pneg %p591_p9 }
  0x2c   : > { %p599_p3 = pnand %p598_p10, %p592_p8 }
  0x2e   : > { %602 = shalt.err (!%p599_p3)
}
  0x2f   : > { %s726_s7 = smov [#allocation7]   ;;  %p35_p11 = scmp.ge.s32.totalorder %s33_s5, 2 }
  0x30   : > { %506 = dma.vmem_to_smem (!%p828_p2), %s159_s28, 32, %s726_s7, [#allocation6]  }
  0x31   : > { %s451_s8 = sshll.u32 %s169_s4, 3  ;;  %s486_s9 = sshll.u32 %s719_s16, 7 }
  0x32   : > { %s1066_s5 = smov (%p35_p11, %s33_s5), 0  ;;  %s860_s30 = scalar_lea.hbm %s1042_s2, %s486_s9 }
  0x33   : > { %s79_s18 = ssub.s32 %s719_s16, %s1066_s5  ;;  %s173_s19 = scalar_lea.vmem [#allocation8], %s451_s8 }
  0x34   : > { %s181_s28 = sshll.u32 %s173_s19, 4  ;;  %p82_p3 = scmp.eq.s32.totalorder %s79_s18, 0  ;;  %s864_s28 = int_to_ptr.vmem [resolvable:$true] %s181_s28 }
  0x35   : > { %s873_s27 = scalar_lea.sflag [#allocation3], %s169_s4  ;;  %s603_s6 = scalar_lea.hbm %s860_s30, 128 }
  0x36   : > { %s869_s26 = scalar_select %p82_p3, %s711_s14, %s84_s20  }
  0x37   : > { %p604_p7 = scmp.ne.s32.totalorder %s860_s30, %s603_s6  ;;  %p605_p8 = pneg %p822_p4 }
  0x38   : > { %s608_s9 = scalar_lea.hbm %s1042_s2, 256  ;;  %p609_p2 = scmp.lt.u32.totalorder %s860_s30, %s1042_s2 }
  0x39   : > { %p606_p9 = pnand %p605_p8, %p604_p7  ;;  %p610_p6 = scmp.lt.u32.totalorder %s608_s9, %s603_s6 }
  0x3a   : > { %p612_p0 = scmp.lt.u32.totalorder %s603_s6, %s860_s30 }
  0x3b   : > { %p607_p12 = pneg %p606_p9  ;;  %p611_p1 = por %p610_p6, %p609_p2 }
  0x3d   : > { %p613_p5 = por %p612_p0, %p611_p1 }
  0x3f   : > { %p614_p10 = pnand %p613_p5, %p607_p12 }
  0x41   : > { %617 = shalt.err (!%p614_p10)
}
  0x42   : > { %s618_s20 = scalar_lea.vmem %s864_s28, 128  ;;  %s727_s4 = smov [#allocation8]  }
  0x43   : > { %p619_p11 = scmp.ne.s32.totalorder %s864_s28, %s618_s20  ;;  %s623_s18 = sshll.u32 %s727_s4, 4  ;;  %s624_s18 = int_to_ptr.vmem [resolvable:$false] %s623_s18 }
  0x44   : > { %s625_s19 = scalar_lea.vmem %s624_s18, 256  ;;  %p626_p9 = scmp.lt.s32.totalorder %s864_s28, %s624_s18 }
  0x45   : > { %p621_p3 = pnand %p619_p11, %p605_p8  ;;  %p627_p2 = scmp.lt.s32.totalorder %s625_s19, %s618_s20 }
  0x47   : > { %p622_p7 = pneg %p621_p3  ;;  %p628_p6 = por %p627_p2, %p626_p9 }
  0x49   : > { %p629_p1 = pnand %p628_p6, %p622_p7 }
  0x4b   : > { %632 = shalt.err (!%p629_p1)
}
  0x4c   : > { %s728_s6 = smov 32   ;;  %s729_s7 = smov 2  }
  0x4d   : > { %510 = dma.hbm_to_vmem [thread:$0]  (!%p822_p4), %s860_s30, 128, %s864_s28, %s873_s27, %s728_s6, %s728_s6, %s729_s7  }
  0x4e   : > { %193 = sbr.rel (%p812_p13) target bundleno = 136 (0x88), region = 32  ;;  %p1055_p8 = scmp.ne.s32.totalorder (!%p812_p13), %s1048_s21, 0 }
  0x55   : > { %686 = dma.done.wait (%p1055_p8), [#allocation5], 64  }
  0x56   : > { %688 = vsyncadd (%p1055_p8), [#allocation5], 4294967232 }
  0x57   : > { %690 = dma.done.wait (%p1055_p8), [#allocation6], 32  }
  0x58   : > { %692 = vsyncadd (%p1055_p8), [#allocation6], 4294967264  ;;  %s912_s8 = sand.u32 1, %s707_s13   ;;  %p1056_p13 = scmp.ne.s32.totalorder %s1049_s22, 0 }
  0x59   : > { %s457_s25 = sshll.u32 %s912_s8, 3  ;;  %s204_s29 = scalar_lea.sflag [#allocation3], %s912_s8 }
  0x5a   : > { %s207_s30 = scalar_lea.vmem [#allocation8], %s457_s25 }
  0x5b   : > { %694 = dma.done.wait (%p1056_p13), %s204_s29, 128  }
  0x5c   : > { %696 = vsyncadd (%p1056_p13), %s204_s29, 4294967168 }
  0x5d   : > { %212 = sfence }
  0x5e   : > { %s923_s21 = sshll.u32 %s715_s15, 7  ;;  %s238_s28 = sld [smem:[#allocation2]]  ;;  %v928_v0 = vld [vmem:[%s207_s30] sm:$0x3]  ;;  %v459_v1 = vld [vmem:[%s207_s30 + $0x2] sm:$0x3] }
  0x5f   : > { %s242_s27 = sld [smem:[#allocation7 + %s923_s21]]  ;;  %s261_s4 = sadd.s32 1, %s923_s21  ;;  %v935_v2 = vld [vmem:[%s207_s30 + $0x4] sm:$0x3]  ;;  %v461_v7 = vld [vmem:[%s207_s30 + $0x6] sm:$0x3] }
  0x60   : > { %s463_s9 = sld [smem:[#allocation2 + $0x1]]  ;;  %s464_s10 = sld [smem:[#allocation2 + $0x2]] }
  0x61   : > { %s926_s11 = sld [smem:[#allocation2 + $0x3]]  ;;  %s466_s20 = sld [smem:[#allocation2 + $0x80]] }
  0x62   : > { %s931_s22 = sld [smem:[#allocation7 + %s261_s4]]  ;;  %s282_s7 = sadd.s32 2, %s923_s21 }
  0x63   : > { %s933_s18 = sld [smem:[#allocation2 + $0x81]]  ;;  %s937_s15 = sld [smem:[#allocation2 + $0x82]] }
  0x64   : > { %v239_v3 = vstv %s238_s28  ;;  %s939_s19 = sld [smem:[#allocation2 + $0x83]]  ;;  %s942_s6 = sld [smem:[#allocation2 + $0x100]] }
  0x65   : > { %v240_v4 = vmul.f32 %v239_v3, %v928_v0  ;;  %v243_v5 = vstv %s242_s27  ;;  %s946_s29 = sld [smem:[#allocation7 + %s282_s7]]  ;;  %s303_s4 = sadd.s32 3, %s923_s21 }
  0x66   : > { %v246_v6 = vstv %s463_s9  ;;  %v250_v9 = vstv %s464_s10  ;;  %s472_s28 = sld [smem:[#allocation2 + $0x101]]  ;;  %s949_s27 = sld [smem:[#allocation2 + $0x102]] }
  0x67   : > { %v247_v8 = vmul.f32 %v459_v1, %v246_v6  ;;  %v254_v10 = vstv %s926_s11  ;;  %v244_v11 = vadd.f32 %v243_v5, %v240_v4  ;;  %v251_v12 = vmul.f32 %v935_v2, %v250_v9  ;;  %s951_s9 = sld [smem:[#allocation2 + $0x103]]  ;;  %s954_s30 = sld [smem:[#allocation2 + $0x180]] }
  0x68   : > { %v259_v13 = vstv %s466_s20  ;;  %v255_v16 = vmul.f32 %v461_v7, %v254_v10  ;;  %v263_v17 = vstv %s931_s22  ;;  %s959_s10 = sld [smem:[#allocation7 + %s303_s4]]  ;;  %s230_s22 = scalar_lea.vmem [#allocation9], %s457_s25 }
  0x69   : > { %v260_v14 = vmul.f32 %v259_v13, %v928_v0  ;;  %v248_v15 = vadd.f32 %v247_v8, %v244_v11  ;;  %v266_v18 = vstv %s933_s18  ;;  %s961_s11 = sld [smem:[#allocation2 + $0x181]]  ;;  %v270_v21 = vstv %s937_s15  ;;  %s965_s20 = sld [smem:[#allocation2 + $0x182]] }
  0x6a   : > { %v267_v20 = vmul.f32 %v459_v1, %v266_v18  ;;  %v274_v22 = vstv %s939_s19  ;;  %s967_s7 = sld [smem:[#allocation2 + $0x183]]  ;;  %v271_v24 = vmul.f32 %v935_v2, %v270_v21  ;;  %v280_v26 = vstv %s942_s6  ;;  %s336_s25 = sshll.u32 %s230_s22, 4  ;;  %s991_s25 = int_to_ptr.vmem [resolvable:$true] %s336_s25 }
  0x6b   : > { %v264_v19 = vadd.f32 %v263_v17, %v260_v14  ;;  %v252_v23 = vadd.f32 %v251_v12, %v248_v15  ;;  %v275_v25 = vmul.f32 %v461_v7, %v274_v22  ;;  %v281_v28 = vmul.f32 %v280_v26, %v928_v0  ;;  %s989_s19 = scalar_lea.hbm %s1043_s3, %s923_s21  ;;  %s322_s6 = scalar_lea.sflag [#allocation4], %s912_s8 }
  0x6c   : > { %v284_v29 = vstv %s946_s29  ;;  %v287_v30 = vstv %s472_s28  ;;  %v291_v33 = vstv %s949_s27  ;;  %s633_s29 = scalar_lea.vmem %s991_s25, 128  ;;  %p1057_p12 = scmp.ne.s32.totalorder %s1050_s23, 0 }
  0x6d   : > { %v268_v27 = vadd.f32 %v267_v20, %v264_v19  ;;  %v256_v31 = vadd.f32 %v255_v16, %v252_v23  ;;  %v288_v32 = vmul.f32 %v459_v1, %v287_v30  ;;  %v295_v34 = vstv %s951_s9  ;;  %p634_p4 = scmp.ne.s32.totalorder %s991_s25, %s633_s29  ;;  %s730_s28 = smov [#allocation9]  }
  0x6e   : > { %v285_v36 = vadd.f32 %v284_v29, %v281_v28  ;;  %v292_v37 = vmul.f32 %v935_v2, %v291_v33  ;;  %v296_v38 = vmul.f32 %v461_v7, %v295_v34  ;;  %v301_v39 = vstv %s954_s30  ;;  %s637_s27 = sshll.u32 %s730_s28, 4  ;;  %s638_s27 = int_to_ptr.vmem [resolvable:$false] %s637_s27 }
  0x6f   : > { %v272_v35 = vadd.f32 %v271_v24, %v268_v27  ;;  %257 = vst [vmem:[%s230_s22] sm:$0x3] %v256_v31  ;;  %v305_v40 = vstv %s959_s10  ;;  %v308_v41 = vstv %s961_s11  ;;  %v302_v44 = vmul.f32 %v301_v39, %v928_v0  ;;  %p635_p0 = pnand %p634_p4, %p1057_p12  ;;  %s639_s9 = scalar_lea.vmem %s638_s27, 256 }
  0x70   : > { %v289_v43 = vadd.f32 %v288_v32, %v285_v36  ;;  %v309_v45 = vmul.f32 %v459_v1, %v308_v41  ;;  %v312_v46 = vstv %s965_s20  ;;  %v316_v47 = vstv %s967_s7  ;;  %p640_p10 = scmp.lt.s32.totalorder %s991_s25, %s638_s27  ;;  %p641_p11 = scmp.lt.s32.totalorder %s639_s9, %s633_s29 }
  0x71   : > { %v276_v42 = vadd.f32 %v275_v25, %v272_v35  ;;  %v306_v49 = vadd.f32 %v305_v40, %v302_v44  ;;  %v313_v50 = vmul.f32 %v935_v2, %v312_v46  ;;  %v317_v53 = vmul.f32 %v461_v7, %v316_v47  ;;  %p636_p5 = pneg %p635_p0 }
  0x72   : > { %v293_v48 = vadd.f32 %v292_v37, %v289_v43  ;;  %p642_p3 = por %p641_p11, %p640_p10 }
  0x73   : > { %470 = vst [vmem:[%s230_s22 + $0x2] sm:$0x3] %v276_v42  ;;  %v310_v52 = vadd.f32 %v309_v45, %v306_v49 }
  0x74   : > { %v297_v51 = vadd.f32 %v296_v38, %v293_v48  ;;  %p643_p7 = pnand %p642_p3, %p636_p5 }
  0x75   : > { %v314_v54 = vadd.f32 %v313_v50, %v310_v52 }
  0x76   : > { %475 = vst [vmem:[%s230_s22 + $0x4] sm:$0x3] %v297_v51 }
  0x77   : > { %v318_v55 = vadd.f32 %v317_v53, %v314_v54 }
  0x79   : > { %480 = vst [vmem:[%s230_s22 + $0x6] sm:$0x3] %v318_v55 }
  0x7a   : > { %646 = shalt.err (!%p643_p7)
}
  0x7b   : > { %s647_s21 = scalar_lea.hbm %s989_s19, 128  ;;  %s651_s10 = scalar_lea.hbm %s1043_s3, 256 }
  0x7c   : > { %p648_p9 = scmp.ne.s32.totalorder %s989_s19, %s647_s21  ;;  %p652_p1 = scmp.lt.u32.totalorder %s989_s19, %s1043_s3 }
  0x7d   : > { %p653_p8 = scmp.lt.u32.totalorder %s651_s10, %s647_s21  ;;  %p655_p4 = scmp.lt.u32.totalorder %s647_s21, %s989_s19 }
  0x7e   : > { %p649_p2 = pnand %p648_p9, %p1057_p12 }
  0x7f   : > { %p654_p13 = por %p653_p8, %p652_p1 }
  0x80   : > { %p650_p6 = pneg %p649_p2 }
  0x81   : > { %p656_p0 = por %p655_p4, %p654_p13 }
  0x83   : > { %p657_p5 = pnand %p656_p0, %p650_p6 }
  0x85   : > { %660 = shalt.err (!%p657_p5)
}
  0x86   : > { %s731_s7 = smov 32   ;;  %s732_s22 = smov 2  }
  0x87   : > { %498 = dma.vmem_to_hbm [thread:$0]  (%p1057_p12), %s991_s25, 128, %s989_s19, %s322_s6, %s731_s7, %s731_s7, %s732_s22  }
  0x88 PF: > { %s351_s18 = sand.u32 1, %s703_s12   ;;  %p1058_p10 = scmp.ne.s32.totalorder %s1051_s24, 0 }
  0x89   : > { %p1059_p11 = scmp.ge.s32.totalorder %s723_s17, 2  ;;  %s352_s15 = scalar_lea.sflag [#allocation4], %s351_s18 }
  0x8b   : > { %p512_p3 = pnand %p1059_p11, %p1058_p10 }
  0x8d   : > { %698 = dma.done.wait (!%p512_p3), %s352_s15, 128  }
  0x8e   : > { %700 = vsyncadd (!%p512_p3), %s352_s15, 4294967168  ;;  %s21_s17 = sadd.s32 1, %s723_s17   ;;  %s1060_s12 = smov %s707_s13 }
  0x8f   : > { %p18_p7 = scmp.ge.s32.totalorder %s21_s17, 4   ;;  %s1061_s13 = smov %s711_s14 }
  0x90   : > { %s1062_s14 = smov %s869_s26  ;;  %s1063_s15 = smov %s719_s16 }
  0x91   : > { %s1064_s16 = smov %s1066_s5  ;;  %20 = sbr.rel (!%p18_p7) target bundleno = 8 (0x8), region = 93 }
  0x98   :  { %357 = vsyncpa [#allocation3], 1 }
  0x99   :  { %359 = vsyncpa [#allocation3 + $0x1], 1 }
  0x9a   :  { %360 = vsyncpa [#allocation4], 1 }
  0x9b   :  { %362 = vsyncpa [#allocation4 + $0x1], 1 }
  0x9c   :  { %363 = vsyncpa [#allocation5], 1 }
  0x9d   :  { %365 = vsyncpa [#allocation5 + $0x1], 1 }
  0x9e   :  { %366 = vsyncpa [#allocation6], 1 }
  0x9f   :  { %368 = vsyncpa [#allocation6 + $0x1], 1 }

</bundles_post_ra>
